<compile_context>
chip_gen: v7x
topology: tpu7x:2x2x1
jax: 0.10.0
libtpu: 0.0.40
codegen_flags: <defaults>
</compile_context>

<pallas_src>
import functools

import jax
import jax.numpy as jnp
from jax.experimental import pallas as pl
from jax.experimental.pallas import tpu as pltpu


def _film_kernel(x_ref, g_ref, b_ref, o_ref):
    # x_ref/o_ref: (row_tile, col_tile) block of the flattened activation.
    # g_ref/b_ref: (row_tile, 1) f32 per-(n, c) scale / shift, lane-broadcast.
    x_f32 = x_ref[...].astype(jnp.float32)
    o_ref[...] = (g_ref[...] * x_f32 + b_ref[...]).astype(o_ref.dtype)


def _round_up(a, b):
    return ((a + b - 1) // b) * b


def _round_down(a, b):
    return (a // b) * b


def _vmem_capacity_bytes():
    """Per-core VMEM capacity; conservative fallback if the query fails."""
    try:
        info = pltpu.get_tpu_info()
        for name in ("vmem_capacity_bytes", "vmem_size_bytes", "vmem_bytes"):
            cap = getattr(info, name, None)
            if cap:
                return int(cap)
    except Exception:
        pass
    return 64 * 1024 * 1024  # v7x per-TC VMEM — the smallest across gens.


@functools.partial(jax.jit, static_argnames=("block_bytes", "donate_x"))
def film3d(x, gammas, betas, *, block_bytes=None, donate_x=False):
    """x: (N, C, D, H, W); gammas, betas: (N, C). Returns gammas*x + betas."""
    N, C, D, H, W = x.shape
    rows = N * C
    cols = D * H * W

    out_dtype = x.dtype
    itemsize = jnp.dtype(out_dtype).itemsize
    lane = 128
    sublane = {4: 8, 2: 16, 1: 32}.get(itemsize, 8)

    # ---- per-generation block budget ---------------------------------------
    vmem_cap = _vmem_capacity_bytes()
    if block_bytes is None:
        # in + out, double-buffered = 4 * block; keep that under ~80% of VMEM
        # and cap at 16 MiB.  -> ~12.8 MiB on v7x (64 MiB), 16 MiB on v5e/v6e.
        block_bytes = int(min(16 * 1024 * 1024, (vmem_cap * 4 // 5) // 4))

    target_elems = max(block_bytes // itemsize, sublane * lane)

    cols_lane = _round_up(cols, lane)
    rows_sub = _round_up(rows, sublane)

    # Column tile: full (lane-rounded) width if it fits the budget at the
    # minimum sublane count; otherwise split as evenly as possible into
    # 128-multiples so edge waste stays bounded.
    max_col_tile = max(lane, _round_down(target_elems // sublane, lane))
    if cols_lane <= max_col_tile:
        col_tile = cols_lane
    else:
        n_col_blocks = pl.cdiv(cols_lane, max_col_tile)
        col_tile = _round_up(pl.cdiv(cols_lane, n_col_blocks), lane)

    # Row tile: fill the remaining budget, again split evenly.
    max_row_tile = max(sublane, _round_down(target_elems // col_tile, sublane))
    if rows_sub <= max_row_tile:
        row_tile = rows_sub
    else:
        n_row_blocks = pl.cdiv(rows_sub, max_row_tile)
        row_tile = _round_up(pl.cdiv(rows_sub, n_row_blocks), sublane)

    # Ragged last blocks are handled by Pallas (masked edge stores); no
    # host-side pad/slice passes over HBM.
    grid = (pl.cdiv(rows, row_tile), pl.cdiv(cols, col_tile))

    # ---- layout glue (zero-copy reshapes only) ------------------------------
    x2 = x.reshape(rows, cols)
    g2 = gammas.reshape(rows, 1).astype(jnp.float32)
    b2 = betas.reshape(rows, 1).astype(jnp.float32)

    # VMEM limit tied to the actual double-buffered footprint (+ gammas/betas
    # + margin), clamped to ~90% of physical VMEM.
    tile_bytes = row_tile * col_tile * itemsize
    vmem_limit = 4 * tile_bytes + 8 * row_tile * 4 + (2 << 20)
    vmem_limit = max(vmem_limit, 32 << 20)
    vmem_limit = min(vmem_limit, (vmem_cap * 9) // 10)

    out2 = pl.pallas_call(
        _film_kernel,
        out_shape=jax.ShapeDtypeStruct((rows, cols), out_dtype),
        grid_spec=pltpu.PrefetchScalarGridSpec(
            num_scalar_prefetch=0,
            grid=grid,
            in_specs=[
                pl.BlockSpec((row_tile, col_tile), lambda i, j: (i, j)),  # x
                pl.BlockSpec((row_tile, 1), lambda i, j: (i, 0)),          # gammas
                pl.BlockSpec((row_tile, 1), lambda i, j: (i, 0)),          # betas
            ],
            out_specs=pl.BlockSpec((row_tile, col_tile), lambda i, j: (i, j)),
        ),
        compiler_params=pltpu.CompilerParams(
            # Rows is the outer axis -> contiguous HBM ranges per TensorCore
            # on v7x; gammas/betas stay resident along the inner col axis.
            dimension_semantics=("parallel", "parallel"),
            vmem_limit_bytes=int(vmem_limit),
        ),
        input_output_aliases=({0: 0} if donate_x else {}),
    )(x2, g2, b2)

    return out2.reshape(N, C, D, H, W)


if __name__ == "__main__":
    key = jax.random.PRNGKey(0)
    kx, kg, kb = jax.random.split(key, 3)

    # Small 5D shapes consistent with FiLM3D: (N, C, D, H, W) and (N, C).
    # 7x7x7 spatial volume (= 343) deliberately exercises the ragged-edge path.
    N, C, D, H, W = 2, 4, 7, 7, 7
    x = jax.random.normal(kx, (N, C, D, H, W), dtype=jnp.float32)
    gammas = jax.random.normal(kg, (N, C), dtype=jnp.float32)
    betas = jax.random.normal(kb, (N, C), dtype=jnp.float32)

    out = film3d(x, gammas, betas)
    out = jax.block_until_ready(out)

    # Reference check in plain JAX (same broadcasting as the PyTorch module).
    ref = gammas[:, :, None, None, None] * x + betas[:, :, None, None, None]
    assert out.shape == x.shape
    assert jnp.allclose(out, ref, atol=1e-6, rtol=1e-6)

    print("KERNEL_OK")
</pallas_src>

<mosaic_0001>
module attributes {stable_mosaic.version = 11 : i64} {
  func.func @_film_kernel(%arg0: i32, %arg1: i32, %arg2: memref<8x384xf32, #tpu.memory_space<vmem>>, %arg3: memref<8x1xf32, #tpu.memory_space<vmem>>, %arg4: memref<8x1xf32, #tpu.memory_space<vmem>>, %arg5: memref<8x384xf32, #tpu.memory_space<vmem>>) attributes {dimension_semantics = [#tpu.dimension_semantics<parallel>, #tpu.dimension_semantics<parallel>], iteration_bounds = array<i64: 1, 1>, scalar_prefetch = 0 : i64, scratch_operands = 0 : i64, tpu.core_type = #tpu.core_type<tc>, window_params = [{transform_indices = @transform_0, window_bounds = array<i64: 8, 384>}, {transform_indices = @transform_1, window_bounds = array<i64: 8, 1>}, {transform_indices = @transform_2, window_bounds = array<i64: 8, 1>}, {transform_indices = @transform_3, window_bounds = array<i64: 8, 384>}]} {
    %c0 = arith.constant 0 : index
    %c0_0 = arith.constant 0 : index
    %0 = vector.load %arg2[%c0, %c0_0] : memref<8x384xf32, #tpu.memory_space<vmem>>, vector<8x384xf32>
    %c0_1 = arith.constant 0 : index
    %c0_2 = arith.constant 0 : index
    %1 = vector.load %arg3[%c0_1, %c0_2] : memref<8x1xf32, #tpu.memory_space<vmem>>, vector<8x1xf32>
    %2 = vector.broadcast %1 : vector<8x1xf32> to vector<8x384xf32>
    %3 = arith.mulf %2, %0 : vector<8x384xf32>
    %c0_3 = arith.constant 0 : index
    %c0_4 = arith.constant 0 : index
    %4 = vector.load %arg4[%c0_3, %c0_4] : memref<8x1xf32, #tpu.memory_space<vmem>>, vector<8x1xf32>
    %5 = vector.broadcast %4 : vector<8x1xf32> to vector<8x384xf32>
    %6 = arith.addf %3, %5 : vector<8x384xf32>
    %c0_5 = arith.constant 0 : index
    %c0_6 = arith.constant 0 : index
    %7 = vector.load %arg5[%c0_5, %c0_6] : memref<8x384xf32, #tpu.memory_space<vmem>>, vector<8x384xf32>
    tpu.vector_store %arg5[%c0_5, %c0_6], %6 {strides = array<i32>} : memref<8x384xf32, #tpu.memory_space<vmem>>, vector<8x384xf32>,
    return
  }
  func.func @transform_0(%arg0: i32, %arg1: i32) -> (i32, i32) {
    %c0_i32 = arith.constant 0 : i32
    return %arg0, %arg1 : i32, i32
  }
  func.func @transform_1(%arg0: i32, %arg1: i32) -> (i32, i32) {
    %c0_i32 = arith.constant 0 : i32
    %c0_i32_0 = arith.constant 0 : i32
    return %arg0, %c0_i32 : i32, i32
  }
  func.func @transform_2(%arg0: i32, %arg1: i32) -> (i32, i32) {
    %c0_i32 = arith.constant 0 : i32
    %c0_i32_0 = arith.constant 0 : i32
    return %arg0, %c0_i32 : i32, i32
  }
  func.func @transform_3(%arg0: i32, %arg1: i32) -> (i32, i32) {
    %c0_i32 = arith.constant 0 : i32
    return %arg0, %arg1 : i32, i32
  }
}

</mosaic_0001>

<bundles_post_ra>
// kernel: film3d.1
= control target key start
LH: loop header
LB: loop body
LE: loop exit
PB: predicated region body
PF: predicated region fallthrough
CT: control target
= control target key end

     0   :  { %v44_v0 = vmov 0   ;;  %s89_s1 = inlined_call_operand.vmem [shape: f32[8,1], index: 1, kind: input, shape index: {}]   ;;  %s90_s2 = inlined_call_operand.vmem [shape: f32[8,1], index: 2, kind: input, shape index: {}]   ;;  %s91_s0 = inlined_call_operand.vmem [shape: f32[8,343], index: 0, kind: input, shape index: {}]   ;;  %s92_s3 = inlined_call_operand.vmem [shape: f32[8,343], index: 3, kind: output, shape index: {}]  }
   0x1   :  { %43 = vset.pattern.permute.xlu0 %v44_v0  ;;  %v17_v1 = vld [vmem:[%s89_s1] sm:$0xff]  ;;  %v15_v5 = vld [vmem:[%s91_s0 + $0x8] sm:$0xff]  ;;  %v16_v6 = vld [vmem:[%s91_s0 + $0x10] sm:$0xff] }
   0x2   :  { %20 = vperm.xlu0 %43, %v17_v1   ;;  %v26_v2 = vld [vmem:[%s90_s2] sm:$0xff] }
   0x3   :  { %v14_v4 = vld [vmem:[%s91_s0] sm:$0xff] }
   0x6   :  { %29 = vperm.xlu0 %43, %v26_v2  }
  0x81   :  { %v21_v3 = vpop.permute.xlu0 %20 }
  0x82   :  { %v23_v7 = vmul.f32 %v21_v3, %v14_v4  ;;  %v24_v8 = vmul.f32 %v21_v3, %v15_v5  ;;  %v25_v9 = vmul.f32 %v21_v3, %v16_v6 }
  0x85   :  { %v30_v10 = vpop.permute.xlu0 %29 }
  0x86   :  { %v32_v11 = vadd.f32 %v30_v10, %v23_v7  ;;  %v33_v12 = vadd.f32 %v30_v10, %v24_v8  ;;  %v34_v13 = vadd.f32 %v30_v10, %v25_v9 }
  0x88   :  { %35 = vst [vmem:[%s92_s3] sm:$0xff] %v32_v11  ;;  %36 = vst [vmem:[%s92_s3 + $0x8] sm:$0xff] %v33_v12 }
  0x89   :  { %37 = vst [vmem:[%s92_s3 + $0x10] sm:$0xff] %v34_v13 }

</bundles_post_ra>
